<compile_context>
chip_gen: v7x
topology: tpu7x:2x2x1
jax: 0.10.0
libtpu: 0.0.40
codegen_flags: <defaults>
</compile_context>

<pallas_src>
import math
import jax
import jax.numpy as jnp
from jax.experimental import pallas as pl
from jax.experimental.pallas import tpu as pltpu

_INV_SQRT2 = 0.7071067811865476
_SQRT_2_OVER_PI = 0.7978845608028654
_PANEL = 128  # rows per in-kernel panel (MXU/VPU interleave granularity)


def _gelu_exact(x):
    # PyTorch nn.GELU() default = exact erf-based GELU (evaluated in f32).
    return 0.5 * x * (1.0 + jax.lax.erf(x * _INV_SQRT2))


def _gelu_tanh(x):
    # Opt-in tanh approximation: tanh lands on the EUP slot instead of a long
    # VALU erf polynomial.  Deviates from exact GELU by up to ~1e-3.
    return 0.5 * x * (1.0 + jnp.tanh(_SQRT_2_OVER_PI * (x + 0.044715 * x * x * x)))


def _round_up(x, m):
    return ((x + m - 1) // m) * m


def _vmem_bytes(tm, D, CPPp, weight_bufs=1):
    """Rough VMEM footprint (bytes) for one grid step."""
    pm = min(tm, _PANEL)
    w = weight_bufs * ((3 * D * D + D * CPPp) * 2 + (3 * D + CPPp) * 4)  # bf16 W, f32 b
    io = 2 * tm * D * 4 + 2 * tm * CPPp * 4          # double-buffered x / out tiles
    act = 6 * pm * max(D, CPPp) * 4                  # ~2 panels of live f32/bf16 temps
    return w + io + act


def _vmem_capacity_bytes():
    """Per-core VMEM capacity; conservative 64 MiB (v7x) if the query fails."""
    try:
        cap = int(pltpu.get_tpu_info().vmem_capacity_bytes)
        if cap > 0:
            return cap
    except Exception:
        pass
    try:
        kind = jax.devices()[0].device_kind.lower()
        if "v5" in kind or "v6" in kind:
            return 128 << 20
    except Exception:
        pass
    return 64 << 20


def _pick_tm(T, D, CPPp, *, vmem_target, min_steps=4):
    """Largest MXU-friendly token tile that keeps >=min_steps grid steps and fits VMEM.

    min_steps=4 keeps >=2 steps per TensorCore on v7x (grid axis is 'parallel'),
    so the weight + first-tile DMA prologue stays overlapped on both cores.
    """
    t8 = _round_up(max(T, 1), 8)
    for tm in (1024, 512, 256, 128, 64, 32, 16, 8):
        steps = -(-t8 // tm)
        if tm != 8 and steps < min_steps:
            continue
        if tm == 8 or _vmem_bytes(tm, D, CPPp, weight_bufs=1) <= vmem_target:
            return tm
    return 8


def _make_kernel(pm, approx_gelu):
    gelu = _gelu_tanh if approx_gelu else _gelu_exact

    def kernel(x_ref, w1_ref, b1_ref, w2_ref, b2_ref, w3_ref, b3_ref,
               wd_ref, bd_ref, out_ref):
        tm, D = x_ref.shape
        CPPp = wd_ref.shape[1]
        n_panels = tm // pm

        # Hoist bias broadcasts out of the panel loop (JAX does not CSE
        # broadcast_in_dim; per-panel re-broadcasts would be pure VALU filler).
        b1 = jnp.broadcast_to(b1_ref[...], (pm, D))
        b2 = jnp.broadcast_to(b2_ref[...], (pm, D))
        b3 = jnp.broadcast_to(b3_ref[...], (pm, D))
        bd = jnp.broadcast_to(bd_ref[...], (pm, CPPp))

        # Static unroll over independent row panels: panel p+1's matmuls (MXU
        # slot) co-issue with panel p's GELU (VALU/EUP), breaking the serial
        # matmul -> GELU -> matmul chain of the single-block version.
        for p in range(n_panels):
            r = p * pm
            x = x_ref[pl.ds(r, pm), :].astype(jnp.bfloat16)
            h = jnp.dot(x, w1_ref[...], preferred_element_type=jnp.float32) + b1
            h = gelu(h).astype(jnp.bfloat16)
            h = jnp.dot(h, w2_ref[...], preferred_element_type=jnp.float32) + b2
            h = gelu(h).astype(jnp.bfloat16)
            h = jnp.dot(h, w3_ref[...], preferred_element_type=jnp.float32) + b3
            h = gelu(h).astype(jnp.bfloat16)
            out = jnp.dot(h, wd_ref[...], preferred_element_type=jnp.float32) + bd
            out_ref[pl.ds(r, pm), :] = out.astype(out_ref.dtype)

    return kernel


def _build_call(tm, pm, Tp, D, CPPp, approx_gelu, vmem_limit, single_buffer_weights):
    kernel = _make_kernel(pm, approx_gelu)

    def tok_spec(cols):
        return pl.BlockSpec((tm, cols), lambda i: (i, 0))

    if single_buffer_weights:
        # Constant-index blocks: fetched once, so a single buffer is enough.
        def const_spec(shape):
            return pl.BlockSpec(shape, lambda i: (0, 0), pipeline_mode=pl.Buffered(1))
    else:
        def const_spec(shape):
            return pl.BlockSpec(shape, lambda i: (0, 0))

    return pl.pallas_call(
        kernel,
        out_shape=jax.ShapeDtypeStruct((Tp, CPPp), jnp.float32),
        grid=(Tp // tm,),
        in_specs=[
            tok_spec(D),                                  # token tile
            const_spec((D, D)), const_spec((1, D)),       # linear 1
            const_spec((D, D)), const_spec((1, D)),       # linear 2
            const_spec((D, D)), const_spec((1, D)),       # linear 3
            const_spec((D, CPPp)), const_spec((1, CPPp)), # convT as linear (padded)
        ],
        out_specs=tok_spec(CPPp),
        compiler_params=pltpu.CompilerParams(
            dimension_semantics=("parallel",),
            vmem_limit_bytes=vmem_limit),
    )


def prepare_params(params, *, in_chans, patch_size):
    """One-time weight prep: bf16 cast + lane-dense padding of the conv map.

    Hoisted out of the forward path so repeated calls don't re-read/re-write the
    full weight set in HBM before every kernel launch.
    """
    w1, b1, w2, b2, w3, b3, wd, bd = params
    D = w1.shape[0]
    CPP = in_chans * patch_size * patch_size
    CPPp = _round_up(CPP, 128)
    bf16 = jnp.bfloat16
    wdp = jnp.zeros((D, CPPp), bf16).at[:, :CPP].set(wd.astype(bf16))
    bdp = jnp.zeros((1, CPPp), jnp.float32).at[:, :CPP].set(
        bd.reshape(1, CPP).astype(jnp.float32))
    return (w1.astype(bf16), b1.reshape(1, D).astype(jnp.float32),
            w2.astype(bf16), b2.reshape(1, D).astype(jnp.float32),
            w3.astype(bf16), b3.reshape(1, D).astype(jnp.float32),
            wdp, bdp)


def rec_head_forward(x, params, *, in_chans, patch_size, tm=None,
                     approx_gelu=False, out_layout="nchw", prepared=False):
    """x: f32[B, N, D] token embeddings.

    Returns f32[B, C, H*P, W*P] (NCHW, matches the PyTorch module) or, with
    out_layout="patches", the free channels-last view f32[B, H, W, C, P, P].
    """
    B, N, D = x.shape
    P, C = patch_size, in_chans
    CPP = C * P * P
    H = W = int(math.sqrt(N))
    assert H * W == N, "number of patches must be a perfect square"
    CPPp = _round_up(CPP, 128)                 # lane-dense output columns

    if not prepared:
        params = prepare_params(params, in_chans=C, patch_size=P)
    w1, b1, w2, b2, w3, b3, wdp, bdp = params

    cap = _vmem_capacity_bytes()
    if tm is None:
        tm = _pick_tm(B * N, D, CPPp, vmem_target=cap * 3 // 5)
    pm = min(tm, _PANEL)

    T = B * N
    Tp = _round_up(T, tm)                      # pad tokens to a whole number of tiles
    x2d = x.reshape(T, D)
    if Tp != T:
        x2d = jnp.pad(x2d, ((0, Tp - T), (0, 0)))

    # Limit sized for the worst (double-buffered) case with headroom, but never
    # above ~75% of this generation's VMEM (48 MiB on v7x, 96 MiB on v5e/v6e).
    vmem_limit = int(min(cap * 3 // 4,
                         max(_vmem_bytes(tm, D, CPPp, weight_bufs=2) * 5 // 4 + (2 << 20),
                             32 << 20)))

    args = (x2d, w1, b1, w2, b2, w3, b3, wdp, bdp)
    try:
        rec = _build_call(tm, pm, Tp, D, CPPp, approx_gelu, vmem_limit,
                          single_buffer_weights=True)(*args)
    except Exception:
        # TODO(synk): pipeline_mode=pl.Buffered(1) unsupported on this JAX/Mosaic
        # build; fall back to default double-buffered weight blocks.
        rec = _build_call(tm, pm, Tp, D, CPPp, approx_gelu, vmem_limit,
                          single_buffer_weights=False)(*args)

    rec = rec[:T, :CPP]
    # rec[b, h*W+w, co*P*P + kh*P + kw] -> out[b, co, h*P+kh, w*P+kw]
    patches = rec.reshape(B, H, W, C, P, P)
    if out_layout == "patches":
        # Free reinterpretation; channels-last consumers can take this directly
        # and skip the full-size HBM transpose below.
        return patches
    return patches.transpose(0, 3, 1, 4, 2, 5).reshape(B, C, H * P, W * P)


def init_params(key, in_dim, in_chans, patch_size):
    """Deterministic synthetic parameters (shapes match the PyTorch module)."""
    D, C, P = in_dim, in_chans, patch_size
    ks = jax.random.split(key, 5)
    std = 0.02
    # trunc_normal_(std=0.02) for the three Linear weights, biases = 0
    tn = lambda k, shape: std * jax.random.truncated_normal(
        k, -2.0, 2.0, shape, dtype=jnp.float32)
    w1 = tn(ks[0], (D, D)); b1 = jnp.zeros((D,), jnp.float32)
    w2 = tn(ks[1], (D, D)); b2 = jnp.zeros((D,), jnp.float32)
    w3 = tn(ks[2], (D, D)); b3 = jnp.zeros((D,), jnp.float32)
    # ConvTranspose2d(D, C, kernel=P, stride=P): weight (D, C, P, P), bias (C,)
    # flattened to a D x (C*P*P) linear map with index co*P*P + kh*P + kw.
    wconv = 0.05 * jax.random.normal(ks[3], (D, C, P, P), dtype=jnp.float32)
    bconv = 0.05 * jax.random.normal(ks[4], (C,), dtype=jnp.float32)
    wd = wconv.reshape(D, C * P * P)
    bd = jnp.broadcast_to(bconv[:, None, None], (C, P, P)).reshape(C * P * P)
    return (w1, b1, w2, b2, w3, b3, wd, bd)


def _reference(x, params, *, in_chans, patch_size):
    B, N, D = x.shape
    P, C = patch_size, in_chans
    H = W = int(math.sqrt(N))
    w1, b1, w2, b2, w3, b3, wd, bd = params
    h = _gelu_exact(x @ w1 + b1)
    h = _gelu_exact(h @ w2 + b2)
    h = _gelu_exact(h @ w3 + b3)
    rec = h @ wd + bd
    out = rec.reshape(B, H, W, C, P, P)
    return out.transpose(0, 3, 1, 4, 2, 5).reshape(B, C, H * P, W * P)


if __name__ == "__main__":
    B, N, D = 2, 16, 32          # batch, num patches (4x4 grid), in_dim
    C, P = 3, 4                  # in_chans, patch_size

    key = jax.random.PRNGKey(0)
    kx, kp = jax.random.split(key)
    x = jax.random.normal(kx, (B, N, D), dtype=jnp.float32)
    params = init_params(kp, D, C, P)

    # Weight prep hoisted out of the forward path (done once).
    pp = prepare_params(params, in_chans=C, patch_size=P)

    out = rec_head_forward(x, pp, in_chans=C, patch_size=P, prepared=True)
    out = jax.block_until_ready(out)

    ref = _reference(x, params, in_chans=C, patch_size=P)
    assert out.shape == (B, C, int(math.sqrt(N)) * P, int(math.sqrt(N)) * P)
    # bf16 MXU operands (f32 accumulation) -> looser tolerance vs the f32 reference.
    err = float(jnp.max(jnp.abs(out - ref)))
    assert jnp.allclose(out, ref, atol=2e-2, rtol=2e-2), err
    print("KERNEL_OK")
</pallas_src>

<mosaic_0001>
module attributes {stable_mosaic.version = 11 : i64} {
  func.func @kernel(%arg0: i32, %arg1: memref<8x32xf32, #tpu.memory_space<vmem>>, %arg2: memref<32x32xbf16, #tpu.memory_space<vmem>>, %arg3: memref<1x32xf32, #tpu.memory_space<vmem>>, %arg4: memref<32x32xbf16, #tpu.memory_space<vmem>>, %arg5: memref<1x32xf32, #tpu.memory_space<vmem>>, %arg6: memref<32x32xbf16, #tpu.memory_space<vmem>>, %arg7: memref<1x32xf32, #tpu.memory_space<vmem>>, %arg8: memref<32x128xbf16, #tpu.memory_space<vmem>>, %arg9: memref<1x128xf32, #tpu.memory_space<vmem>>, %arg10: memref<8x128xf32, #tpu.memory_space<vmem>>) attributes {dimension_semantics = [#tpu.dimension_semantics<parallel>], iteration_bounds = array<i64: 4>, scalar_prefetch = 0 : i64, scratch_operands = 0 : i64, tpu.core_type = #tpu.core_type<tc>, window_params = [{transform_indices = @transform_0, window_bounds = array<i64: 8, 32>}, {pipeline_mode = #tpu.pipeline_mode<synchronous>, transform_indices = @transform_1, window_bounds = array<i64: 32, 32>}, {pipeline_mode = #tpu.pipeline_mode<synchronous>, transform_indices = @transform_2, window_bounds = array<i64: 1, 32>}, {pipeline_mode = #tpu.pipeline_mode<synchronous>, transform_indices = @transform_3, window_bounds = array<i64: 32, 32>}, {pipeline_mode = #tpu.pipeline_mode<synchronous>, transform_indices = @transform_4, window_bounds = array<i64: 1, 32>}, {pipeline_mode = #tpu.pipeline_mode<synchronous>, transform_indices = @transform_5, window_bounds = array<i64: 32, 32>}, {pipeline_mode = #tpu.pipeline_mode<synchronous>, transform_indices = @transform_6, window_bounds = array<i64: 1, 32>}, {pipeline_mode = #tpu.pipeline_mode<synchronous>, transform_indices = @transform_7, window_bounds = array<i64: 32, 128>}, {pipeline_mode = #tpu.pipeline_mode<synchronous>, transform_indices = @transform_8, window_bounds = array<i64: 1, 128>}, {transform_indices = @transform_9, window_bounds = array<i64: 8, 128>}]} {
    %c0 = arith.constant 0 : index
    %c0_0 = arith.constant 0 : index
    %0 = vector.load %arg3[%c0, %c0_0] : memref<1x32xf32, #tpu.memory_space<vmem>>, vector<1x32xf32>
    %1 = vector.shape_cast %0 : vector<1x32xf32> to vector<1x32xf32>
    %2 = vector.broadcast %1 : vector<1x32xf32> to vector<8x32xf32>
    %c0_1 = arith.constant 0 : index
    %c0_2 = arith.constant 0 : index
    %3 = vector.load %arg5[%c0_1, %c0_2] : memref<1x32xf32, #tpu.memory_space<vmem>>, vector<1x32xf32>
    %4 = vector.shape_cast %3 : vector<1x32xf32> to vector<1x32xf32>
    %5 = vector.broadcast %4 : vector<1x32xf32> to vector<8x32xf32>
    %c0_3 = arith.constant 0 : index
    %c0_4 = arith.constant 0 : index
    %6 = vector.load %arg7[%c0_3, %c0_4] : memref<1x32xf32, #tpu.memory_space<vmem>>, vector<1x32xf32>
    %7 = vector.shape_cast %6 : vector<1x32xf32> to vector<1x32xf32>
    %8 = vector.broadcast %7 : vector<1x32xf32> to vector<8x32xf32>
    %c0_5 = arith.constant 0 : index
    %c0_6 = arith.constant 0 : index
    %9 = vector.load %arg9[%c0_5, %c0_6] : memref<1x128xf32, #tpu.memory_space<vmem>>, vector<1x128xf32>
    %10 = vector.shape_cast %9 : vector<1x128xf32> to vector<1x128xf32>
    %11 = vector.broadcast %10 : vector<1x128xf32> to vector<8x128xf32>
    %c0_7 = arith.constant 0 : index
    %c0_8 = arith.constant 0 : index
    %12 = vector.load %arg1[%c0_7, %c0_8] : memref<8x32xf32, #tpu.memory_space<vmem>>, vector<8x32xf32>
    %13 = arith.truncf %12 : vector<8x32xf32> to vector<8x32xbf16>
    %c0_9 = arith.constant 0 : index
    %c0_10 = arith.constant 0 : index
    %14 = vector.load %arg2[%c0_9, %c0_10] : memref<32x32xbf16, #tpu.memory_space<vmem>>, vector<32x32xbf16>
    %cst = arith.constant dense<0.000000e+00> : vector<8x32xf32>
    %15 = tpu.matmul %13, %14, %cst {dimension_numbers = #tpu.dot_dimension_numbers<[1], [0], [0], [1], [0, 0, 1, 1], [], []>} : vector<8x32xbf16>, vector<32x32xbf16>, vector<8x32xf32> -> vector<8x32xf32>
    %16 = arith.addf %15, %2 : vector<8x32xf32>
    %cst_11 = arith.constant 5.000000e-01 : f32
    %17 = vector.broadcast %cst_11 : f32 to vector<8x32xf32>
    %18 = arith.mulf %17, %16 : vector<8x32xf32>
    %cst_12 = arith.constant 0.707106769 : f32
    %19 = vector.broadcast %cst_12 : f32 to vector<8x32xf32>
    %20 = arith.mulf %16, %19 : vector<8x32xf32>
    %21 = math.erf %20 : vector<8x32xf32>
    %cst_13 = arith.constant 1.000000e+00 : f32
    %22 = vector.broadcast %cst_13 : f32 to vector<8x32xf32>
    %23 = arith.addf %22, %21 : vector<8x32xf32>
    %24 = arith.mulf %18, %23 : vector<8x32xf32>
    %25 = arith.truncf %24 : vector<8x32xf32> to vector<8x32xbf16>
    %c0_14 = arith.constant 0 : index
    %c0_15 = arith.constant 0 : index
    %26 = vector.load %arg4[%c0_14, %c0_15] : memref<32x32xbf16, #tpu.memory_space<vmem>>, vector<32x32xbf16>
    %cst_16 = arith.constant dense<0.000000e+00> : vector<8x32xf32>
    %27 = tpu.matmul %25, %26, %cst_16 {dimension_numbers = #tpu.dot_dimension_numbers<[1], [0], [0], [1], [0, 0, 1, 1], [], []>} : vector<8x32xbf16>, vector<32x32xbf16>, vector<8x32xf32> -> vector<8x32xf32>
    %28 = arith.addf %27, %5 : vector<8x32xf32>
    %cst_17 = arith.constant 5.000000e-01 : f32
    %29 = vector.broadcast %cst_17 : f32 to vector<8x32xf32>
    %30 = arith.mulf %29, %28 : vector<8x32xf32>
    %cst_18 = arith.constant 0.707106769 : f32
    %31 = vector.broadcast %cst_18 : f32 to vector<8x32xf32>
    %32 = arith.mulf %28, %31 : vector<8x32xf32>
    %33 = math.erf %32 : vector<8x32xf32>
    %cst_19 = arith.constant 1.000000e+00 : f32
    %34 = vector.broadcast %cst_19 : f32 to vector<8x32xf32>
    %35 = arith.addf %34, %33 : vector<8x32xf32>
    %36 = arith.mulf %30, %35 : vector<8x32xf32>
    %37 = arith.truncf %36 : vector<8x32xf32> to vector<8x32xbf16>
    %c0_20 = arith.constant 0 : index
    %c0_21 = arith.constant 0 : index
    %38 = vector.load %arg6[%c0_20, %c0_21] : memref<32x32xbf16, #tpu.memory_space<vmem>>, vector<32x32xbf16>
    %cst_22 = arith.constant dense<0.000000e+00> : vector<8x32xf32>
    %39 = tpu.matmul %37, %38, %cst_22 {dimension_numbers = #tpu.dot_dimension_numbers<[1], [0], [0], [1], [0, 0, 1, 1], [], []>} : vector<8x32xbf16>, vector<32x32xbf16>, vector<8x32xf32> -> vector<8x32xf32>
    %40 = arith.addf %39, %8 : vector<8x32xf32>
    %cst_23 = arith.constant 5.000000e-01 : f32
    %41 = vector.broadcast %cst_23 : f32 to vector<8x32xf32>
    %42 = arith.mulf %41, %40 : vector<8x32xf32>
    %cst_24 = arith.constant 0.707106769 : f32
    %43 = vector.broadcast %cst_24 : f32 to vector<8x32xf32>
    %44 = arith.mulf %40, %43 : vector<8x32xf32>
    %45 = math.erf %44 : vector<8x32xf32>
    %cst_25 = arith.constant 1.000000e+00 : f32
    %46 = vector.broadcast %cst_25 : f32 to vector<8x32xf32>
    %47 = arith.addf %46, %45 : vector<8x32xf32>
    %48 = arith.mulf %42, %47 : vector<8x32xf32>
    %49 = arith.truncf %48 : vector<8x32xf32> to vector<8x32xbf16>
    %c0_26 = arith.constant 0 : index
    %c0_27 = arith.constant 0 : index
    %50 = vector.load %arg8[%c0_26, %c0_27] : memref<32x128xbf16, #tpu.memory_space<vmem>>, vector<32x128xbf16>
    %cst_28 = arith.constant dense<0.000000e+00> : vector<8x128xf32>
    %51 = tpu.matmul %49, %50, %cst_28 {dimension_numbers = #tpu.dot_dimension_numbers<[1], [0], [0], [1], [0, 0, 1, 1], [], []>} : vector<8x32xbf16>, vector<32x128xbf16>, vector<8x128xf32> -> vector<8x128xf32>
    %52 = arith.addf %51, %11 : vector<8x128xf32>
    %c0_29 = arith.constant 0 : index
    %c0_30 = arith.constant 0 : index
    %53 = vector.load %arg10[%c0_29, %c0_30] : memref<8x128xf32, #tpu.memory_space<vmem>>, vector<8x128xf32>
    tpu.vector_store %arg10[%c0_29, %c0_30], %52 {strides = array<i32>} : memref<8x128xf32, #tpu.memory_space<vmem>>, vector<8x128xf32>,
    return
  }
  func.func @transform_0(%arg0: i32) -> (i32, i32) {
    %c0_i32 = arith.constant 0 : i32
    %c0_i32_0 = arith.constant 0 : i32
    return %arg0, %c0_i32 : i32, i32
  }
  func.func @transform_1(%arg0: i32) -> (i32, i32) {
    %c0_i32 = arith.constant 0 : i32
    %c0_i32_0 = arith.constant 0 : i32
    %c0_i32_1 = arith.constant 0 : i32
    return %c0_i32, %c0_i32_0 : i32, i32
  }
  func.func @transform_2(%arg0: i32) -> (i32, i32) {
    %c0_i32 = arith.constant 0 : i32
    %c0_i32_0 = arith.constant 0 : i32
    %c0_i32_1 = arith.constant 0 : i32
    return %c0_i32, %c0_i32_0 : i32, i32
  }
  func.func @transform_3(%arg0: i32) -> (i32, i32) {
    %c0_i32 = arith.constant 0 : i32
    %c0_i32_0 = arith.constant 0 : i32
    %c0_i32_1 = arith.constant 0 : i32
    return %c0_i32, %c0_i32_0 : i32, i32
  }
  func.func @transform_4(%arg0: i32) -> (i32, i32) {
    %c0_i32 = arith.constant 0 : i32
    %c0_i32_0 = arith.constant 0 : i32
    %c0_i32_1 = arith.constant 0 : i32
    return %c0_i32, %c0_i32_0 : i32, i32
  }
  func.func @transform_5(%arg0: i32) -> (i32, i32) {
    %c0_i32 = arith.constant 0 : i32
    %c0_i32_0 = arith.constant 0 : i32
    %c0_i32_1 = arith.constant 0 : i32
    return %c0_i32, %c0_i32_0 : i32, i32
  }
  func.func @transform_6(%arg0: i32) -> (i32, i32) {
    %c0_i32 = arith.constant 0 : i32
    %c0_i32_0 = arith.constant 0 : i32
    %c0_i32_1 = arith.constant 0 : i32
    return %c0_i32, %c0_i32_0 : i32, i32
  }
  func.func @transform_7(%arg0: i32) -> (i32, i32) {
    %c0_i32 = arith.constant 0 : i32
    %c0_i32_0 = arith.constant 0 : i32
    %c0_i32_1 = arith.constant 0 : i32
    return %c0_i32, %c0_i32_0 : i32, i32
  }
  func.func @transform_8(%arg0: i32) -> (i32, i32) {
    %c0_i32 = arith.constant 0 : i32
    %c0_i32_0 = arith.constant 0 : i32
    %c0_i32_1 = arith.constant 0 : i32
    return %c0_i32, %c0_i32_0 : i32, i32
  }
  func.func @transform_9(%arg0: i32) -> (i32, i32) {
    %c0_i32 = arith.constant 0 : i32
    %c0_i32_0 = arith.constant 0 : i32
    return %arg0, %c0_i32 : i32, i32
  }
}

module attributes {stable_mosaic.version = 11 : i64} {
  func.func @kernel(%arg0: i32, %arg1: memref<8x32xf32, #tpu.memory_space<vmem>>, %arg2: memref<32x32xbf16, #tpu.memory_space<vmem>>, %arg3: memref<1x32xf32, #tpu.memory_space<vmem>>, %arg4: memref<32x32xbf16, #tpu.memory_space<vmem>>, %arg5: memref<1x32xf32, #tpu.memory_space<vmem>>, %arg6: memref<32x32xbf16, #tpu.memory_space<vmem>>, %arg7: memref<1x32xf32, #tpu.memory_space<vmem>>, %arg8: memref<32x128xbf16, #tpu.memory_space<vmem>>, %arg9: memref<1x128xf32, #tpu.memory_space<vmem>>, %arg10: memref<8x128xf32, #tpu.memory_space<vmem>>) attributes {dimension_semantics = [#tpu.dimension_semantics<parallel>], iteration_bounds = array<i64: 4>, scalar_prefetch = 0 : i64, scratch_operands = 0 : i64, tpu.core_type = #tpu.core_type<tc>, window_params = [{transform_indices = @transform_0, window_bounds = array<i64: 8, 32>}, {pipeline_mode = #tpu.pipeline_mode<synchronous>, transform_indices = @transform_1, window_bounds = array<i64: 32, 32>}, {pipeline_mode = #tpu.pipeline_mode<synchronous>, transform_indices = @transform_2, window_bounds = array<i64: 1, 32>}, {pipeline_mode = #tpu.pipeline_mode<synchronous>, transform_indices = @transform_3, window_bounds = array<i64: 32, 32>}, {pipeline_mode = #tpu.pipeline_mode<synchronous>, transform_indices = @transform_4, window_bounds = array<i64: 1, 32>}, {pipeline_mode = #tpu.pipeline_mode<synchronous>, transform_indices = @transform_5, window_bounds = array<i64: 32, 32>}, {pipeline_mode = #tpu.pipeline_mode<synchronous>, transform_indices = @transform_6, window_bounds = array<i64: 1, 32>}, {pipeline_mode = #tpu.pipeline_mode<synchronous>, transform_indices = @transform_7, window_bounds = array<i64: 32, 128>}, {pipeline_mode = #tpu.pipeline_mode<synchronous>, transform_indices = @transform_8, window_bounds = array<i64: 1, 128>}, {transform_indices = @transform_9, window_bounds = array<i64: 8, 128>}]} {
    %c0 = arith.constant 0 : index
    %c0_0 = arith.constant 0 : index
    %0 = vector.load %arg3[%c0, %c0_0] : memref<1x32xf32, #tpu.memory_space<vmem>>, vector<1x32xf32>
    %1 = vector.shape_cast %0 : vector<1x32xf32> to vector<1x32xf32>
    %2 = vector.broadcast %1 : vector<1x32xf32> to vector<8x32xf32>
    %c0_1 = arith.constant 0 : index
    %c0_2 = arith.constant 0 : index
    %3 = vector.load %arg5[%c0_1, %c0_2] : memref<1x32xf32, #tpu.memory_space<vmem>>, vector<1x32xf32>
    %4 = vector.shape_cast %3 : vector<1x32xf32> to vector<1x32xf32>
    %5 = vector.broadcast %4 : vector<1x32xf32> to vector<8x32xf32>
    %c0_3 = arith.constant 0 : index
    %c0_4 = arith.constant 0 : index
    %6 = vector.load %arg7[%c0_3, %c0_4] : memref<1x32xf32, #tpu.memory_space<vmem>>, vector<1x32xf32>
    %7 = vector.shape_cast %6 : vector<1x32xf32> to vector<1x32xf32>
    %8 = vector.broadcast %7 : vector<1x32xf32> to vector<8x32xf32>
    %c0_5 = arith.constant 0 : index
    %c0_6 = arith.constant 0 : index
    %9 = vector.load %arg9[%c0_5, %c0_6] : memref<1x128xf32, #tpu.memory_space<vmem>>, vector<1x128xf32>
    %10 = vector.shape_cast %9 : vector<1x128xf32> to vector<1x128xf32>
    %11 = vector.broadcast %10 : vector<1x128xf32> to vector<8x128xf32>
    %c0_7 = arith.constant 0 : index
    %c0_8 = arith.constant 0 : index
    %12 = vector.load %arg1[%c0_7, %c0_8] : memref<8x32xf32, #tpu.memory_space<vmem>>, vector<8x32xf32>
    %13 = arith.truncf %12 : vector<8x32xf32> to vector<8x32xbf16>
    %c0_9 = arith.constant 0 : index
    %c0_10 = arith.constant 0 : index
    %14 = vector.load %arg2[%c0_9, %c0_10] : memref<32x32xbf16, #tpu.memory_space<vmem>>, vector<32x32xbf16>
    %cst = arith.constant dense<0.000000e+00> : vector<8x32xf32>
    %15 = tpu.matmul %13, %14, %cst {dimension_numbers = #tpu.dot_dimension_numbers<[1], [0], [0], [1], [0, 0, 1, 1], [], []>} : vector<8x32xbf16>, vector<32x32xbf16>, vector<8x32xf32> -> vector<8x32xf32>
    %16 = arith.addf %15, %2 : vector<8x32xf32>
    %cst_11 = arith.constant 5.000000e-01 : f32
    %17 = vector.broadcast %cst_11 : f32 to vector<8x32xf32>
    %18 = arith.mulf %17, %16 : vector<8x32xf32>
    %cst_12 = arith.constant 0.707106769 : f32
    %19 = vector.broadcast %cst_12 : f32 to vector<8x32xf32>
    %20 = arith.mulf %16, %19 : vector<8x32xf32>
    %21 = math.erf %20 : vector<8x32xf32>
    %cst_13 = arith.constant 1.000000e+00 : f32
    %22 = vector.broadcast %cst_13 : f32 to vector<8x32xf32>
    %23 = arith.addf %22, %21 : vector<8x32xf32>
    %24 = arith.mulf %18, %23 : vector<8x32xf32>
    %25 = arith.truncf %24 : vector<8x32xf32> to vector<8x32xbf16>
    %c0_14 = arith.constant 0 : index
    %c0_15 = arith.constant 0 : index
    %26 = vector.load %arg4[%c0_14, %c0_15] : memref<32x32xbf16, #tpu.memory_space<vmem>>, vector<32x32xbf16>
    %cst_16 = arith.constant dense<0.000000e+00> : vector<8x32xf32>
    %27 = tpu.matmul %25, %26, %cst_16 {dimension_numbers = #tpu.dot_dimension_numbers<[1], [0], [0], [1], [0, 0, 1, 1], [], []>} : vector<8x32xbf16>, vector<32x32xbf16>, vector<8x32xf32> -> vector<8x32xf32>
    %28 = arith.addf %27, %5 : vector<8x32xf32>
    %cst_17 = arith.constant 5.000000e-01 : f32
    %29 = vector.broadcast %cst_17 : f32 to vector<8x32xf32>
    %30 = arith.mulf %29, %28 : vector<8x32xf32>
    %cst_18 = arith.constant 0.707106769 : f32
    %31 = vector.broadcast %cst_18 : f32 to vector<8x32xf32>
    %32 = arith.mulf %28, %31 : vector<8x32xf32>
    %33 = math.erf %32 : vector<8x32xf32>
    %cst_19 = arith.constant 1.000000e+00 : f32
    %34 = vector.broadcast %cst_19 : f32 to vector<8x32xf32>
    %35 = arith.addf %34, %33 : vector<8x32xf32>
    %36 = arith.mulf %30, %35 : vector<8x32xf32>
    %37 = arith.truncf %36 : vector<8x32xf32> to vector<8x32xbf16>
    %c0_20 = arith.constant 0 : index
    %c0_21 = arith.constant 0 : index
    %38 = vector.load %arg6[%c0_20, %c0_21] : memref<32x32xbf16, #tpu.memory_space<vmem>>, vector<32x32xbf16>
    %cst_22 = arith.constant dense<0.000000e+00> : vector<8x32xf32>
    %39 = tpu.matmul %37, %38, %cst_22 {dimension_numbers = #tpu.dot_dimension_numbers<[1], [0], [0], [1], [0, 0, 1, 1], [], []>} : vector<8x32xbf16>, vector<32x32xbf16>, vector<8x32xf32> -> vector<8x32xf32>
    %40 = arith.addf %39, %8 : vector<8x32xf32>
    %cst_23 = arith.constant 5.000000e-01 : f32
    %41 = vector.broadcast %cst_23 : f32 to vector<8x32xf32>
    %42 = arith.mulf %41, %40 : vector<8x32xf32>
    %cst_24 = arith.constant 0.707106769 : f32
    %43 = vector.broadcast %cst_24 : f32 to vector<8x32xf32>
    %44 = arith.mulf %40, %43 : vector<8x32xf32>
    %45 = math.erf %44 : vector<8x32xf32>
    %cst_25 = arith.constant 1.000000e+00 : f32
    %46 = vector.broadcast %cst_25 : f32 to vector<8x32xf32>
    %47 = arith.addf %46, %45 : vector<8x32xf32>
    %48 = arith.mulf %42, %47 : vector<8x32xf32>
    %49 = arith.truncf %48 : vector<8x32xf32> to vector<8x32xbf16>
    %c0_26 = arith.constant 0 : index
    %c0_27 = arith.constant 0 : index
    %50 = vector.load %arg8[%c0_26, %c0_27] : memref<32x128xbf16, #tpu.memory_space<vmem>>, vector<32x128xbf16>
    %cst_28 = arith.constant dense<0.000000e+00> : vector<8x128xf32>
    %51 = tpu.matmul %49, %50, %cst_28 {dimension_numbers = #tpu.dot_dimension_numbers<[1], [0], [0], [1], [0, 0, 1, 1], [], []>} : vector<8x32xbf16>, vector<32x128xbf16>, vector<8x128xf32> -> vector<8x128xf32>
    %52 = arith.addf %51, %11 : vector<8x128xf32>
    %c0_29 = arith.constant 0 : index
    %c0_30 = arith.constant 0 : index
    %53 = vector.load %arg10[%c0_29, %c0_30] : memref<8x128xf32, #tpu.memory_space<vmem>>, vector<8x128xf32>
    tpu.vector_store %arg10[%c0_29, %c0_30], %52 {strides = array<i32>} : memref<8x128xf32, #tpu.memory_space<vmem>>, vector<8x128xf32>,
    return
  }
  func.func @transform_0(%arg0: i32) -> (i32, i32) {
    %c0_i32 = arith.constant 0 : i32
    %c0_i32_0 = arith.constant 0 : i32
    return %arg0, %c0_i32 : i32, i32
  }
  func.func @transform_1(%arg0: i32) -> (i32, i32) {
    %c0_i32 = arith.constant 0 : i32
    %c0_i32_0 = arith.constant 0 : i32
    %c0_i32_1 = arith.constant 0 : i32
    return %c0_i32, %c0_i32_0 : i32, i32
  }
  func.func @transform_2(%arg0: i32) -> (i32, i32) {
    %c0_i32 = arith.constant 0 : i32
    %c0_i32_0 = arith.constant 0 : i32
    %c0_i32_1 = arith.constant 0 : i32
    return %c0_i32, %c0_i32_0 : i32, i32
  }
  func.func @transform_3(%arg0: i32) -> (i32, i32) {
    %c0_i32 = arith.constant 0 : i32
    %c0_i32_0 = arith.constant 0 : i32
    %c0_i32_1 = arith.constant 0 : i32
    return %c0_i32, %c0_i32_0 : i32, i32
  }
  func.func @transform_4(%arg0: i32) -> (i32, i32) {
    %c0_i32 = arith.constant 0 : i32
    %c0_i32_0 = arith.constant 0 : i32
    %c0_i32_1 = arith.constant 0 : i32
    return %c0_i32, %c0_i32_0 : i32, i32
  }
  func.func @transform_5(%arg0: i32) -> (i32, i32) {
    %c0_i32 = arith.constant 0 : i32
    %c0_i32_0 = arith.constant 0 : i32
    %c0_i32_1 = arith.constant 0 : i32
    return %c0_i32, %c0_i32_0 : i32, i32
  }
  func.func @transform_6(%arg0: i32) -> (i32, i32) {
    %c0_i32 = arith.constant 0 : i32
    %c0_i32_0 = arith.constant 0 : i32
    %c0_i32_1 = arith.constant 0 : i32
    return %c0_i32, %c0_i32_0 : i32, i32
  }
  func.func @transform_7(%arg0: i32) -> (i32, i32) {
    %c0_i32 = arith.constant 0 : i32
    %c0_i32_0 = arith.constant 0 : i32
    %c0_i32_1 = arith.constant 0 : i32
    return %c0_i32, %c0_i32_0 : i32, i32
  }
  func.func @transform_8(%arg0: i32) -> (i32, i32) {
    %c0_i32 = arith.constant 0 : i32
    %c0_i32_0 = arith.constant 0 : i32
    %c0_i32_1 = arith.constant 0 : i32
    return %c0_i32, %c0_i32_0 : i32, i32
  }
  func.func @transform_9(%arg0: i32) -> (i32, i32) {
    %c0_i32 = arith.constant 0 : i32
    %c0_i32_0 = arith.constant 0 : i32
    return %arg0, %c0_i32 : i32, i32
  }
}

</mosaic_0001>

<bundles_post_ra>
// kernel: tpu_custom_call.1
= control target key start
LH: loop header
LB: loop body
LE: loop exit
PB: predicated region body
PF: predicated region fallthrough
CT: control target
= control target key end

     0   :  { %s1505_s0 = inlined_call_operand.hbm [shape: f32[32,32], index: 0, kind: input, shape index: {}]   ;;  %s1506_s1 = inlined_call_operand.hbm [shape: bf16[32,32], index: 1, kind: input, shape index: {}]   ;;  %s1507_s2 = inlined_call_operand.vmem [shape: f32[1,32], index: 2, kind: input, shape index: {}]   ;;  %s1508_s3 = inlined_call_operand.hbm [shape: bf16[32,32], index: 3, kind: input, shape index: {}]   ;;  %s1509_s4 = inlined_call_operand.vmem [shape: f32[1,32], index: 4, kind: input, shape index: {}]   ;;  %s1510_s5 = inlined_call_operand.vmem [shape: bf16[32,32], index: 5, kind: input, shape index: {}]   ;;  %s1511_s6 = inlined_call_operand.vmem [shape: f32[1,32], index: 6, kind: input, shape index: {}]   ;;  %s1512_s7 = inlined_call_operand.hbm [shape: bf16[32,128], index: 7, kind: input, shape index: {}]   ;;  %s1513_s8 = inlined_call_operand.vmem [shape: f32[1,128], index: 8, kind: input, shape index: {}]   ;;  %s1514_s9 = inlined_call_operand.hbm [shape: f32[32,128], index: 9, kind: output, shape index: {}]  }
   0x1   :  { %1521 = sst [smem:[#allocation17_spill]] %s1514_s9 }
   0x2   :  { %14 = vsyncpa [#allocation3], 0 }
   0x3   :  { %16 = vsyncpa [#allocation3 + $0x1], 0 }
   0x4   :  { %17 = vsyncpa [#allocation6], 0 }
   0x5   :  { %18 = vsyncpa [#allocation9], 0 }
   0x6   :  { %19 = vsyncpa [#allocation4], 0 }
   0x7   :  { %21 = vsyncpa [#allocation4 + $0x1], 0  ;;  %s1214_s30 = smov 0   ;;  %s1216_s10 = smov 0  }
   0x8   :  { %s1218_s11 = smov 0   ;;  %s1220_s12 = smov 0  }
   0x9 LB: > { %1522 = sst [smem:[#allocation15_spill]] %s1141_s30  ;;  %s1235_s13 = sadd.s32 4294967295, %s1153_s12   ;;  %s1153_s12 = sphi %s1220_s12, %s1545_s12   ;;  %s1149_s11 = sphi %s1218_s11, %s1544_s11   ;;  %s1145_s10 = sphi %s1216_s10, %s1543_s10   ;;  %s1141_s30 = sphi %s1214_s30, %s1542_s30  }
   0xa   : > { %s792_s14 = sadd.s32 4294967294, %s1153_s12   ;;  %p47_p0 = scmp.ne.s32.totalorder %s1145_s10, %s1141_s30 }
   0xb   : > { %p1515_p1 = scmp.eq.s32.totalorder %s1235_s13, 0  ;;  %p245_p3 = scmp.eq.s32.totalorder %s792_s14, 3 }
   0xc   : > { %p793_p5 = scmp.ge.s32.totalorder %s1153_s12, 1  ;;  %p252_p7 = scmp.lt.s32.totalorder %s1153_s12, 5 }
   0xd   : > { %p1244_p4 = por %p1515_p1, %p47_p0  ;;  %p1249_p6 = por %p245_p3, %p47_p0 }
   0xe   : > { %p1254_p8 = pnand %p793_p5, %p252_p7  ;;  %s1155_s18 = smov [#allocation5]  }
   0xf   : > { %s1523_s15 = scalar_select %p1244_p4, 1, 0 }
  0x10   : > { %s1524_s16 = scalar_select %p1249_p6, 1, 0 }
  0x11   : > { %s1526_s17 = scalar_select %p1254_p8, 1, 0 }
  0x12   : > { %1525 = sst [smem:[#allocation16_spill]] %s1524_s16  ;;  %s264_s19 = sshll.u32 %s1155_s18, 4  ;;  %s1258_s19 = int_to_ptr.vmem [resolvable:$true] %s264_s19 }
  0x13   : > { %p886_p9 = pneg %p1254_p8  ;;  %s1156_s21 = smov [#allocation7]  }
  0x14   : > { %s280_s22 = sshll.u32 %s1156_s21, 4  ;;  %s1157_s23 = smov [#allocation8]   ;;  %s1268_s22 = int_to_ptr.vmem [resolvable:$true] %s280_s22 }
  0x15   : > { %p1264_p10 = pnand %p886_p9, %p1515_p1  ;;  %s1270_s24 = sshll.u32 %s1157_s23, 4  ;;  %s303_s24 = int_to_ptr.vmem [resolvable:$true] %s1270_s24 }
  0x16   : > { %s965_s27 = scalar_lea.hbm %s1506_s1, 256 }
  0x17   : > { %p966_p11 = scmp.ne.s32.totalorder %s1506_s1, %s965_s27  ;;  %p1280_p12 = pneg %p1264_p10 }
  0x18   : > { %p972_p3 = scmp.lt.u32.totalorder %s965_s27, %s1506_s1 }
  0x19   : > { %p968_p13 = pnand %p1280_p12, %p966_p11 }
  0x1b   : > { %p969_p0 = pneg %p968_p13 }
  0x1d   : > { %p974_p5 = pnand %p972_p3, %p969_p0 }
  0x1f   : > { %977 = shalt.err (!%p974_p5)
}
  0x20   : > { %s978_s23 = scalar_lea.vmem %s1258_s19, 256  ;;  %p986_p2 = scmp.lt.s32.totalorder %s1258_s19, %s1258_s19 }
  0x21   : > { %p979_p7 = scmp.ne.s32.totalorder %s1258_s19, %s978_s23  ;;  %p987_p6 = scmp.lt.s32.totalorder %s978_s23, %s978_s23 }
  0x23   : > { %p981_p9 = pnand %p979_p7, %p1280_p12  ;;  %p988_p11 = por %p987_p6, %p986_p2 }
  0x25   : > { %p982_p1 = pneg %p981_p9 }
  0x27   : > { %p989_p13 = pnand %p988_p11, %p982_p1 }
  0x29   : > { %992 = shalt.err (!%p989_p13)
}
  0x2a   : > { %s1158_s25 = smov 64   ;;  %s1159_s26 = smov 4  }
  0x2b   : > { %889 = dma.hbm_to_vmem [thread:$0]  (!%p1264_p10), %s1506_s1, 256, %s1258_s19, [#allocation6], %s1158_s25, %s1158_s25, %s1159_s26  }
  0x2c   : > { %s993_s21 = scalar_lea.hbm %s1508_s3, 256 }
  0x2d   : > { %p994_p1 = scmp.ne.s32.totalorder %s1508_s3, %s993_s21  ;;  %p1000_p0 = scmp.lt.u32.totalorder %s993_s21, %s1508_s3 }
  0x2f   : > { %p996_p2 = pnand %p994_p1, %p1280_p12 }
  0x31   : > { %p997_p6 = pneg %p996_p2 }
  0x33   : > { %p1002_p3 = pnand %p1000_p0, %p997_p6 }
  0x35   : > { %1005 = shalt.err (!%p1002_p3)
}
  0x36   : > { %s1006_s19 = scalar_lea.vmem %s1268_s22, 256  ;;  %p1014_p11 = scmp.lt.s32.totalorder %s1268_s22, %s1268_s22 }
  0x37   : > { %p1007_p5 = scmp.ne.s32.totalorder %s1268_s22, %s1006_s19  ;;  %p1015_p13 = scmp.lt.s32.totalorder %s1006_s19, %s1006_s19 }
  0x39   : > { %p1009_p7 = pnand %p1007_p5, %p1280_p12  ;;  %p1016_p1 = por %p1015_p13, %p1014_p11 }
  0x3b   : > { %p1010_p9 = pneg %p1009_p7 }
  0x3d   : > { %p1017_p2 = pnand %p1016_p1, %p1010_p9 }
  0x3f   : > { %1020 = shalt.err (!%p1017_p2)
}
  0x40   : > { %892 = dma.hbm_to_vmem [thread:$0]  (!%p1264_p10), %s1508_s3, 256, %s1268_s22, [#allocation6], %s1158_s25, %s1158_s25, %s1159_s26  }
  0x41   : > { %s1021_s28 = scalar_lea.hbm %s1512_s7, 256 }
  0x42   : > { %p1022_p6 = scmp.ne.s32.totalorder %s1512_s7, %s1021_s28  ;;  %p1028_p5 = scmp.lt.u32.totalorder %s1021_s28, %s1512_s7 }
  0x44   : > { %p1024_p0 = pnand %p1022_p6, %p1280_p12 }
  0x46   : > { %p1025_p3 = pneg %p1024_p0 }
  0x48   : > { %p1030_p7 = pnand %p1028_p5, %p1025_p3 }
  0x4a   : > { %1033 = shalt.err (!%p1030_p7)
}
  0x4b   : > { %s1034_s19 = scalar_lea.vmem %s303_s24, 256  ;;  %p1042_p1 = scmp.lt.s32.totalorder %s303_s24, %s303_s24 }
  0x4c   : > { %p1035_p9 = scmp.ne.s32.totalorder %s303_s24, %s1034_s19  ;;  %p1043_p2 = scmp.lt.s32.totalorder %s1034_s19, %s1034_s19 }
  0x4e   : > { %p1037_p11 = pnand %p1035_p9, %p1280_p12  ;;  %p1044_p4 = por %p1043_p2, %p1042_p1 }
  0x50   : > { %p1038_p13 = pneg %p1037_p11 }
  0x52   : > { %p1045_p8 = pnand %p1044_p4, %p1038_p13 }
  0x54   : > { %1048 = shalt.err (!%p1045_p8)
}
  0x55   : > { %895 = dma.hbm_to_vmem [thread:$0]  (!%p1264_p10), %s1512_s7, 256, %s303_s24, [#allocation9], %s1158_s25, %s1158_s25, %s1159_s26  }
  0x56   : > { %s1353_s14 = sadd.s32 1, %s1153_s12   ;;  %s34_s30 = sadd.s32 1, %s1149_s11 }
  0x57   : > { %s31_s20 = ssub.s32 %s1153_s12, %s1353_s14  ;;  %p41_p8 = scmp.ne.s32.totalorder %s1149_s11, %s1145_s10 }
  0x58   : > { %p32_p4 = scmp.eq.s32.totalorder %s31_s20, 0  ;;  %p42_p12 = scmp.eq.s32.totalorder %s1153_s12, 0 }
  0x59   : > { %p907_p6 = scmp.lt.s32.totalorder %s1153_s12, 4  ;;  %p1529_p3 = scmp.eq.s32.totalorder %s1235_s13, 3 }
  0x5a   : > { %s1363_s16 = scalar_select %p32_p4, %s1149_s11, %s34_s30  }
  0x5b   : > { %p43_p0 = por %p42_p12, %p41_p8  ;;  %p1367_p5 = por %p1529_p3, %p41_p8 }
  0x5c   : > { %s319_s28 = sand.u32 1, %s1149_s11   ;;  %s799_s29 = sshll.u32 %s1153_s12, 7 }
  0x5d   : > { %s798_s24 = sshll.u32 %s319_s28, 3  ;;  %s1376_s18 = scalar_lea.hbm %s1505_s0, %s799_s29 }
  0x5e   : > { %s323_s21 = scalar_lea.vmem [#allocation2], %s798_s24  ;;  %p1378_p10 = pnand %p907_p6, %p43_p0 }
  0x5f   : > { %s330_s23 = sshll.u32 %s323_s21, 4  ;;  %s320_s22 = scalar_lea.sflag [#allocation3], %s319_s28  ;;  %s1382_s23 = int_to_ptr.vmem [resolvable:$true] %s330_s23 }
  0x60   : > { %s1049_s9 = scalar_lea.hbm %s1376_s18, 128  ;;  %p1051_p9 = pneg %p1378_p10 }
  0x61   : > { %p1050_p7 = scmp.ne.s32.totalorder %s1376_s18, %s1049_s9  ;;  %s1054_s29 = scalar_lea.hbm %s1505_s0, 512 }
  0x62   : > { %p1055_p1 = scmp.lt.u32.totalorder %s1376_s18, %s1505_s0  ;;  %p1056_p2 = scmp.lt.u32.totalorder %s1054_s29, %s1049_s9 }
  0x63   : > { %p1052_p11 = pnand %p1051_p9, %p1050_p7  ;;  %p1058_p8 = scmp.lt.u32.totalorder %s1049_s9, %s1376_s18 }
  0x64   : > { %p1057_p4 = por %p1056_p2, %p1055_p1 }
  0x65   : > { %p1053_p13 = pneg %p1052_p11 }
  0x66   : > { %p1059_p12 = por %p1058_p8, %p1057_p4 }
  0x68   : > { %p1060_p6 = pnand %p1059_p12, %p1053_p13 }
  0x6a   : > { %1063 = shalt.err (!%p1060_p6)
}
  0x6b   : > { %s1064_s28 = scalar_lea.vmem %s1382_s23, 128  ;;  %s1160_s26 = smov [#allocation2]  }
  0x6c   : > { %p1065_p0 = scmp.ne.s32.totalorder %s1382_s23, %s1064_s28  ;;  %s1069_s21 = sshll.u32 %s1160_s26, 4  ;;  %s1070_s21 = int_to_ptr.vmem [resolvable:$false] %s1069_s21 }
  0x6d   : > { %s1071_s20 = scalar_lea.vmem %s1070_s21, 256  ;;  %p1072_p11 = scmp.lt.s32.totalorder %s1382_s23, %s1070_s21 }
  0x6e   : > { %p1067_p3 = pnand %p1065_p0, %p1051_p9  ;;  %p1073_p1 = scmp.lt.s32.totalorder %s1071_s20, %s1064_s28 }
  0x70   : > { %p1068_p7 = pneg %p1067_p3  ;;  %p1074_p2 = por %p1073_p1, %p1072_p11 }
  0x72   : > { %p1075_p4 = pnand %p1074_p2, %p1068_p7 }
  0x74   : > { %1078 = shalt.err (!%p1075_p4)
}
  0x75   : > { %899 = dma.hbm_to_vmem [thread:$0]  (!%p1378_p10), %s1376_s18, 128, %s1382_s23, %s320_s22  }
  0x76   : > { %p1532_p13 = scmp.ne.s32.totalorder %s1526_s17, 0 }
  0x77   : > { %s1412_s9 = sand.u32 (!%p1532_p13), 1, %s1145_s10   ;;  %p1533_p9 = scmp.ne.s32.totalorder (!%p1532_p13), %s1523_s15, 0 }
  0x78   : > { %339 = sbr.rel (%p1532_p13) target bundleno = 1072 (0x430), region = 56  ;;  %s801_s30 = sshll.u32 (!%p1532_p13), %s1412_s9, 3 }
  0x79   : > { %s342_s29 = scalar_lea.sflag (!%p1532_p13), [#allocation3], %s1412_s9  ;;  %s345_s24 = scalar_lea.vmem (!%p1532_p13), [#allocation2], %s801_s30 }
  0x7f   : > { %1124 = dma.done.wait (%p1533_p9), %s342_s29, 128  }
  0x80   : > { %1126 = vsyncadd (%p1533_p9), %s342_s29, 4294967168  ;;  %p1534_p10 = scmp.eq.s32.totalorder %s1235_s13, 0 }
  0x82   : > { %1128 = dma.done.wait (%p1534_p10), [#allocation6], 512   ;;  %p1535_p8 = pmov %p1534_p10 }
  0x84   : > { %1130 = vsyncadd (%p1535_p8), [#allocation6], 4294966784  ;;  %p1536_p12 = pmov %p1535_p8 }
  0x85   : > { %p1537_p6 = pmov %p1535_p8 }
  0x86   : > { %1132 = dma.done.wait (%p1536_p12), [#allocation9], 256  }
  0x87   : > { %1134 = vsyncadd (%p1537_p6), [#allocation9], 4294967040  ;;  %v1161_v0 = vmov 0.0   ;;  %vm1162_vm0 = vmmov 0   ;;  %v951_v1 = vld [vmem:[#allocation5] sm:$0xff]   ;;  %v952_v2 = vld [vmem:[#allocation5 + $0x8] sm:$0xff]  }
  0x88   : > { %838 = vmatprep.subr.bf16.mxu0 %v1161_v0  ;;  %842 = vmatprep.mubr.msk.bf16.mxu0 %vm1162_vm0, %v1161_v0  ;;  %v421_v3 = vld [vmem:[%s345_s24] sm:$0xff]  ;;  %vm439_vm1 = vcmask 261120   ;;  %v957_v33 = vld [vmem:[#allocation8] sm:$0xff]   ;;  %v958_v34 = vld [vmem:[#allocation8 + $0x8] sm:$0xff]   ;;  %s823_s24 = sshll.u32 %s1235_s13, 7  ;;  %s391_s15 = scalar_lea.vmem [#allocation10], %s801_s30 }
  0x89   : > { %846 = vmatprep.subr.bf16.mxu1 %v1161_v0  ;;  %850 = vmatprep.mubr.msk.bf16.mxu1 %vm1162_vm0, %v1161_v0  ;;  %v422_v4 = vpack.c.bf16 %v421_v3, %v421_v3  ;;  %v953_v5 = vld [vmem:[#allocation7] sm:$0xff]   ;;  %v954_v6 = vld [vmem:[#allocation7 + $0x8] sm:$0xff]   ;;  %s693_s17 = sshll.u32 %s391_s15, 4  ;;  %s1538_s19 = sld [smem:[#allocation17_spill]]  ;;  %s1464_s17 = int_to_ptr.vmem [resolvable:$true] %s693_s17 }
  0x8a   : > { %839 = vmatpush3.bf16.msra.mxu0 %v951_v1  ;;  %847 = vmatpush3.bf16.msra.mxu1 %v953_v5  ;;  %v806_v7 = vld [vmem:[%s1507_s2] ss:$0 sm:$0xff]  ;;  %v956_v20 = vld [vmem:[%s1510_s5 + $0x8] sm:$0xff]   ;;  %s680_s13 = scalar_lea.sflag [#allocation4], %s1412_s9  ;;  %s1079_s25 = scalar_lea.vmem %s1464_s17, 128 }
  0x8b   : > { %840 = vmatprep.subr.bf16.mxu0 %v1161_v0  ;;  %848 = vmatprep.subr.bf16.mxu1 %v1161_v0  ;;  %v955_v19 = vld [vmem:[%s1510_s5] sm:$0xff]   ;;  %p1080_p0 = scmp.ne.s32.totalorder %s1464_s17, %s1079_s25  ;;  %s1163_s30 = smov [#allocation10]  }
  0x8c   : > { %v807_v21 = vld [vmem:[%s1509_s4] ss:$0 sm:$0xff]  ;;  %s1083_s28 = sshll.u32 %s1163_s30, 4  ;;  %s1084_s28 = int_to_ptr.vmem [resolvable:$false] %s1083_s28 }
  0x8d   : > { %v808_v35 = vld [vmem:[%s1511_s6] ss:$0 sm:$0xff]  ;;  %p1081_p3 = pnand %p1080_p0, %p1367_p5  ;;  %s1085_s26 = scalar_lea.vmem %s1084_s28, 256 }
  0x8e   : > { %841 = vmatpush3.bf16.msra.mxu0 %v952_v2  ;;  %849 = vmatpush3.bf16.msra.mxu1 %v954_v6  ;;  %v809_v47 = vld [vmem:[%s1513_s8] ss:$0 sm:$0xff]  ;;  %p1086_p11 = scmp.lt.s32.totalorder %s1464_s17, %s1084_s28  ;;  %p1087_p1 = scmp.lt.s32.totalorder %s1085_s26, %s1079_s25 }
  0x8f   : > { %854 = vmatprep.subr.bf16.mxu0 %v1161_v0  ;;  %862 = vmatprep.subr.bf16.mxu1 %v1161_v0  ;;  %s1462_s22 = scalar_lea.hbm %s1538_s19, %s823_s24  ;;  %p1082_p7 = pneg %p1081_p3 }
  0x90   : > { %p1088_p2 = por %p1087_p1, %p1086_p11 }
  0x91   : > { %843 = vmatmul.mubr.msk.bf16.vlgmr.msra.gmra.mrb[0].mxu0 %vm439_vm1, %v422_v4 }
  0x92   : > { %858 = vmatprep.mubr.msk.bf16.mxu0 %vm1162_vm0, %v1161_v0  ;;  %855 = vmatpush3.bf16.msra.mxu0 %v955_v19  ;;  %p1089_p4 = pnand %p1088_p2, %p1082_p7 }
  0x93   : > { %856 = vmatprep.subr.bf16.mxu0 %v1161_v0 }
  0x96   : > { %857 = vmatpush3.bf16.msra.mxu0 %v956_v20 }
 0x164   : > { %v477_v8 = vpop.f32.mrb[0].mxu0 }
 0x165   : > { %v478_v9 = vadd.f32 %v806_v7, %v477_v8  ;;  %v844_v10 = vpop.f32.mrb[1].mxu0 }
 0x166   : > { %v480_v11 = vpop.f32.mrb[2].mxu0 }
 0x167   : > { %v484_v12 = vmul.f32 0.70710677, %v478_v9  ;;  %v845_v13 = vpop.f32.mrb[3].mxu0  ;;  %v483_v15 = vmul.f32 0.5, %v478_v9 }
 0x169   : > { %959 = verf.f32 %v484_v12 }
 0x173   : > { %v960_v14 = vpop.eup %959 }
 0x174   : > { %v486_v16 = vadd.f32 1.0, %v960_v14 }
 0x176   : > { %v487_v17 = vmul.f32 %v486_v16, %v483_v15 }
 0x178   : > { %v488_v18 = vpack.c.bf16 %v487_v17, %v487_v17 }
 0x17a   : > { %851 = vmatmul.mubr.msk.bf16.vlgmr.msra.gmra.mrb[0].mxu1 %vm439_vm1, %v488_v18 }
 0x17b   : > { %866 = vmatprep.mubr.msk.bf16.mxu1 %vm1162_vm0, %v1161_v0  ;;  %863 = vmatpush3.bf16.msra.mxu1 %v957_v33 }
 0x17c   : > { %864 = vmatprep.subr.bf16.mxu1 %v1161_v0 }
 0x17f   : > { %865 = vmatpush3.bf16.msra.mxu1 %v958_v34 }
 0x24d   : > { %v542_v22 = vpop.f32.mrb[0].mxu1 }
 0x24e   : > { %v543_v23 = vadd.f32 %v807_v21, %v542_v22  ;;  %v852_v24 = vpop.f32.mrb[1].mxu1 }
 0x24f   : > { %v545_v25 = vpop.f32.mrb[2].mxu1 }
 0x250   : > { %v549_v26 = vmul.f32 0.70710677, %v543_v23  ;;  %v853_v27 = vpop.f32.mrb[3].mxu1  ;;  %v548_v29 = vmul.f32 0.5, %v543_v23 }
 0x252   : > { %961 = verf.f32 %v549_v26 }
 0x25c   : > { %v962_v28 = vpop.eup %961 }
 0x25d   : > { %v551_v30 = vadd.f32 1.0, %v962_v28 }
 0x25f   : > { %v552_v31 = vmul.f32 %v551_v30, %v548_v29 }
 0x261   : > { %v553_v32 = vpack.c.bf16 %v552_v31, %v552_v31 }
 0x263   : > { %859 = vmatmul.mubr.msk.bf16.vlgmr.msra.gmra.mrb[4].mxu0 %vm439_vm1, %v553_v32 }
 0x336   : > { %v607_v36 = vpop.f32.mrb[4].mxu0 }
 0x337   : > { %v608_v37 = vadd.f32 %v808_v35, %v607_v36  ;;  %v860_v38 = vpop.f32.mrb[5].mxu0 }
 0x338   : > { %v610_v39 = vpop.f32.mrb[6].mxu0 }
 0x339   : > { %v614_v40 = vmul.f32 0.70710677, %v608_v37  ;;  %v861_v41 = vpop.f32.mrb[7].mxu0  ;;  %v613_v43 = vmul.f32 0.5, %v608_v37 }
 0x33b   : > { %963 = verf.f32 %v614_v40 }
 0x345   : > { %v964_v42 = vpop.eup %963 }
 0x346   : > { %v616_v44 = vadd.f32 1.0, %v964_v42 }
 0x348   : > { %v617_v45 = vmul.f32 %v616_v44, %v613_v43 }
 0x34a   : > { %v618_v46 = vpack.c.bf16 %v617_v45, %v617_v45 }
 0x34c   : > { %867 = vmatmul.mubr.msk.bf16.vlgmr.msra.gmra.mrb[4].mxu1 %vm439_vm1, %v618_v46 }
 0x41f   : > { %v672_v48 = vpop.f32.mrb[4].mxu1 }
 0x420   : > { %v673_v49 = vadd.f32 %v809_v47, %v672_v48  ;;  %v868_v50 = vpop.f32.mrb[5].mxu1 }
 0x421   : > { %v675_v51 = vpop.f32.mrb[6].mxu1 }
 0x422   : > { %678 = vst [vmem:[%s391_s15] sm:$0xff] %v673_v49  ;;  %v869_v52 = vpop.f32.mrb[7].mxu1 }
 0x423   : > { %1092 = shalt.err (!%p1089_p4)
}
 0x424   : > { %s1093_s9 = scalar_lea.hbm %s1462_s22, 128  ;;  %s1097_s29 = scalar_lea.hbm %s1538_s19, 512 }
 0x425   : > { %p1094_p13 = scmp.ne.s32.totalorder %s1462_s22, %s1093_s9  ;;  %p1098_p8 = scmp.lt.u32.totalorder %s1462_s22, %s1538_s19 }
 0x426   : > { %p1099_p12 = scmp.lt.u32.totalorder %s1097_s29, %s1093_s9  ;;  %p1101_p0 = scmp.lt.u32.totalorder %s1093_s9, %s1462_s22 }
 0x427   : > { %p1095_p9 = pnand %p1094_p13, %p1367_p5 }
 0x428   : > { %p1100_p6 = por %p1099_p12, %p1098_p8 }
 0x429   : > { %p1096_p10 = pneg %p1095_p9 }
 0x42a   : > { %p1102_p3 = por %p1101_p0, %p1100_p6 }
 0x42c   : > { %p1103_p7 = pnand %p1102_p3, %p1096_p10 }
 0x42e   : > { %1106 = shalt.err (!%p1103_p7)
}
 0x42f   : > { %884 = dma.vmem_to_hbm [thread:$0]  (%p1367_p5), %s1464_s17, 128, %s1462_s22, %s680_s13  }
 0x430 PF: > { %s1539_s18 = sld [smem:[#allocation15_spill]]  ;;  %s1540_s23 = sld [smem:[#allocation16_spill]] }
 0x431   : > { %p911_p11 = scmp.ge.s32.totalorder %s1153_s12, 2 }
 0x436   : > { %s705_s25 = sand.u32 1, %s1539_s18   ;;  %p1541_p1 = scmp.ne.s32.totalorder %s1540_s23, 0 }
 0x437   : > { %s706_s30 = scalar_lea.sflag [#allocation4], %s705_s25 }
 0x438   : > { %p901_p2 = pnand %p911_p11, %p1541_p1 }
 0x43a   : > { %1136 = dma.done.wait (!%p901_p2), %s706_s30, 128  }
 0x43b   : > { %1138 = vsyncadd (!%p901_p2), %s706_s30, 4294967168  ;;  %p24_p4 = scmp.ge.s32.totalorder %s1353_s14, 6   ;;  %s1542_s30 = smov %s1145_s10 }
 0x43c   : > { %s1543_s10 = smov %s1149_s11  ;;  %s1544_s11 = smov %s1363_s16 }
 0x43d   : > { %s1545_s12 = smov %s1353_s14  ;;  %26 = sbr.rel (!%p24_p4) target bundleno = 9 (0x9), region = 113 }
 0x444   :  { %711 = vsyncpa [#allocation3], 1 }
 0x445   :  { %713 = vsyncpa [#allocation3 + $0x1], 1 }
 0x446   :  { %714 = vsyncpa [#allocation6], 1 }
 0x447   :  { %715 = vsyncpa [#allocation9], 1 }
 0x448   :  { %716 = vsyncpa [#allocation4], 1 }
 0x449   :  { %718 = vsyncpa [#allocation4 + $0x1], 1 }

// kernel: tpu_custom_call.1
= control target key start
LH: loop header
LB: loop body
LE: loop exit
PB: predicated region body
PF: predicated region fallthrough
CT: control target
= control target key end

     0   :  { %s1505_s0 = inlined_call_operand.hbm [shape: f32[32,32], index: 0, kind: input, shape index: {}]   ;;  %s1506_s1 = inlined_call_operand.hbm [shape: bf16[32,32], index: 1, kind: input, shape index: {}]   ;;  %s1507_s2 = inlined_call_operand.vmem [shape: f32[1,32], index: 2, kind: input, shape index: {}]   ;;  %s1508_s3 = inlined_call_operand.hbm [shape: bf16[32,32], index: 3, kind: input, shape index: {}]   ;;  %s1509_s4 = inlined_call_operand.vmem [shape: f32[1,32], index: 4, kind: input, shape index: {}]   ;;  %s1510_s5 = inlined_call_operand.vmem [shape: bf16[32,32], index: 5, kind: input, shape index: {}]   ;;  %s1511_s6 = inlined_call_operand.vmem [shape: f32[1,32], index: 6, kind: input, shape index: {}]   ;;  %s1512_s7 = inlined_call_operand.hbm [shape: bf16[32,128], index: 7, kind: input, shape index: {}]   ;;  %s1513_s8 = inlined_call_operand.vmem [shape: f32[1,128], index: 8, kind: input, shape index: {}]   ;;  %s1514_s9 = inlined_call_operand.hbm [shape: f32[32,128], index: 9, kind: output, shape index: {}]  }
   0x1   :  { %1521 = sst [smem:[#allocation17_spill]] %s1514_s9 }
   0x2   :  { %14 = vsyncpa [#allocation3], 0 }
   0x3   :  { %16 = vsyncpa [#allocation3 + $0x1], 0 }
   0x4   :  { %17 = vsyncpa [#allocation6], 0 }
   0x5   :  { %18 = vsyncpa [#allocation9], 0 }
   0x6   :  { %19 = vsyncpa [#allocation4], 0 }
   0x7   :  { %21 = vsyncpa [#allocation4 + $0x1], 0  ;;  %s1214_s30 = smov 0   ;;  %s1216_s10 = smov 0  }
   0x8   :  { %s1218_s11 = smov 0   ;;  %s1220_s12 = smov 0  }
   0x9 LB: > { %1522 = sst [smem:[#allocation15_spill]] %s1141_s30  ;;  %s1235_s13 = sadd.s32 4294967295, %s1153_s12   ;;  %s1153_s12 = sphi %s1220_s12, %s1545_s12   ;;  %s1149_s11 = sphi %s1218_s11, %s1544_s11   ;;  %s1145_s10 = sphi %s1216_s10, %s1543_s10   ;;  %s1141_s30 = sphi %s1214_s30, %s1542_s30  }
   0xa   : > { %s792_s14 = sadd.s32 4294967294, %s1153_s12   ;;  %p47_p0 = scmp.ne.s32.totalorder %s1145_s10, %s1141_s30 }
   0xb   : > { %p1515_p1 = scmp.eq.s32.totalorder %s1235_s13, 0  ;;  %p245_p3 = scmp.eq.s32.totalorder %s792_s14, 3 }
   0xc   : > { %p793_p5 = scmp.ge.s32.totalorder %s1153_s12, 1  ;;  %p252_p7 = scmp.lt.s32.totalorder %s1153_s12, 5 }
   0xd   : > { %p1244_p4 = por %p1515_p1, %p47_p0  ;;  %p1249_p6 = por %p245_p3, %p47_p0 }
   0xe   : > { %p1254_p8 = pnand %p793_p5, %p252_p7  ;;  %s1155_s18 = smov [#allocation5]  }
   0xf   : > { %s1523_s15 = scalar_select %p1244_p4, 1, 0 }
  0x10   : > { %s1524_s16 = scalar_select %p1249_p6, 1, 0 }
  0x11   : > { %s1526_s17 = scalar_select %p1254_p8, 1, 0 }
  0x12   : > { %1525 = sst [smem:[#allocation16_spill]] %s1524_s16  ;;  %s264_s19 = sshll.u32 %s1155_s18, 4  ;;  %s1258_s19 = int_to_ptr.vmem [resolvable:$true] %s264_s19 }
  0x13   : > { %p886_p9 = pneg %p1254_p8  ;;  %s1156_s21 = smov [#allocation7]  }
  0x14   : > { %s280_s22 = sshll.u32 %s1156_s21, 4  ;;  %s1157_s23 = smov [#allocation8]   ;;  %s1268_s22 = int_to_ptr.vmem [resolvable:$true] %s280_s22 }
  0x15   : > { %p1264_p10 = pnand %p886_p9, %p1515_p1  ;;  %s1270_s24 = sshll.u32 %s1157_s23, 4  ;;  %s303_s24 = int_to_ptr.vmem [resolvable:$true] %s1270_s24 }
  0x16   : > { %s965_s27 = scalar_lea.hbm %s1506_s1, 256 }
  0x17   : > { %p966_p11 = scmp.ne.s32.totalorder %s1506_s1, %s965_s27  ;;  %p1280_p12 = pneg %p1264_p10 }
  0x18   : > { %p972_p3 = scmp.lt.u32.totalorder %s965_s27, %s1506_s1 }
  0x19   : > { %p968_p13 = pnand %p1280_p12, %p966_p11 }
  0x1b   : > { %p969_p0 = pneg %p968_p13 }
  0x1d   : > { %p974_p5 = pnand %p972_p3, %p969_p0 }
  0x1f   : > { %977 = shalt.err (!%p974_p5)
}
  0x20   : > { %s978_s23 = scalar_lea.vmem %s1258_s19, 256  ;;  %p986_p2 = scmp.lt.s32.totalorder %s1258_s19, %s1258_s19 }
  0x21   : > { %p979_p7 = scmp.ne.s32.totalorder %s1258_s19, %s978_s23  ;;  %p987_p6 = scmp.lt.s32.totalorder %s978_s23, %s978_s23 }
  0x23   : > { %p981_p9 = pnand %p979_p7, %p1280_p12  ;;  %p988_p11 = por %p987_p6, %p986_p2 }
  0x25   : > { %p982_p1 = pneg %p981_p9 }
  0x27   : > { %p989_p13 = pnand %p988_p11, %p982_p1 }
  0x29   : > { %992 = shalt.err (!%p989_p13)
}
  0x2a   : > { %s1158_s25 = smov 64   ;;  %s1159_s26 = smov 4  }
  0x2b   : > { %889 = dma.hbm_to_vmem [thread:$0]  (!%p1264_p10), %s1506_s1, 256, %s1258_s19, [#allocation6], %s1158_s25, %s1158_s25, %s1159_s26  }
  0x2c   : > { %s993_s21 = scalar_lea.hbm %s1508_s3, 256 }
  0x2d   : > { %p994_p1 = scmp.ne.s32.totalorder %s1508_s3, %s993_s21  ;;  %p1000_p0 = scmp.lt.u32.totalorder %s993_s21, %s1508_s3 }
  0x2f   : > { %p996_p2 = pnand %p994_p1, %p1280_p12 }
  0x31   : > { %p997_p6 = pneg %p996_p2 }
  0x33   : > { %p1002_p3 = pnand %p1000_p0, %p997_p6 }
  0x35   : > { %1005 = shalt.err (!%p1002_p3)
}
  0x36   : > { %s1006_s19 = scalar_lea.vmem %s1268_s22, 256  ;;  %p1014_p11 = scmp.lt.s32.totalorder %s1268_s22, %s1268_s22 }
  0x37   : > { %p1007_p5 = scmp.ne.s32.totalorder %s1268_s22, %s1006_s19  ;;  %p1015_p13 = scmp.lt.s32.totalorder %s1006_s19, %s1006_s19 }
  0x39   : > { %p1009_p7 = pnand %p1007_p5, %p1280_p12  ;;  %p1016_p1 = por %p1015_p13, %p1014_p11 }
  0x3b   : > { %p1010_p9 = pneg %p1009_p7 }
  0x3d   : > { %p1017_p2 = pnand %p1016_p1, %p1010_p9 }
  0x3f   : > { %1020 = shalt.err (!%p1017_p2)
}
  0x40   : > { %892 = dma.hbm_to_vmem [thread:$0]  (!%p1264_p10), %s1508_s3, 256, %s1268_s22, [#allocation6], %s1158_s25, %s1158_s25, %s1159_s26  }
  0x41   : > { %s1021_s28 = scalar_lea.hbm %s1512_s7, 256 }
  0x42   : > { %p1022_p6 = scmp.ne.s32.totalorder %s1512_s7, %s1021_s28  ;;  %p1028_p5 = scmp.lt.u32.totalorder %s1021_s28, %s1512_s7 }
  0x44   : > { %p1024_p0 = pnand %p1022_p6, %p1280_p12 }
  0x46   : > { %p1025_p3 = pneg %p1024_p0 }
  0x48   : > { %p1030_p7 = pnand %p1028_p5, %p1025_p3 }
  0x4a   : > { %1033 = shalt.err (!%p1030_p7)
}
  0x4b   : > { %s1034_s19 = scalar_lea.vmem %s303_s24, 256  ;;  %p1042_p1 = scmp.lt.s32.totalorder %s303_s24, %s303_s24 }
  0x4c   : > { %p1035_p9 = scmp.ne.s32.totalorder %s303_s24, %s1034_s19  ;;  %p1043_p2 = scmp.lt.s32.totalorder %s1034_s19, %s1034_s19 }
  0x4e   : > { %p1037_p11 = pnand %p1035_p9, %p1280_p12  ;;  %p1044_p4 = por %p1043_p2, %p1042_p1 }
  0x50   : > { %p1038_p13 = pneg %p1037_p11 }
  0x52   : > { %p1045_p8 = pnand %p1044_p4, %p1038_p13 }
  0x54   : > { %1048 = shalt.err (!%p1045_p8)
}
  0x55   : > { %895 = dma.hbm_to_vmem [thread:$0]  (!%p1264_p10), %s1512_s7, 256, %s303_s24, [#allocation9], %s1158_s25, %s1158_s25, %s1159_s26  }
  0x56   : > { %s1353_s14 = sadd.s32 1, %s1153_s12   ;;  %s34_s30 = sadd.s32 1, %s1149_s11 }
  0x57   : > { %s31_s20 = ssub.s32 %s1153_s12, %s1353_s14  ;;  %p41_p8 = scmp.ne.s32.totalorder %s1149_s11, %s1145_s10 }
  0x58   : > { %p32_p4 = scmp.eq.s32.totalorder %s31_s20, 0  ;;  %p42_p12 = scmp.eq.s32.totalorder %s1153_s12, 0 }
  0x59   : > { %p907_p6 = scmp.lt.s32.totalorder %s1153_s12, 4  ;;  %p1529_p3 = scmp.eq.s32.totalorder %s1235_s13, 3 }
  0x5a   : > { %s1363_s16 = scalar_select %p32_p4, %s1149_s11, %s34_s30  }
  0x5b   : > { %p43_p0 = por %p42_p12, %p41_p8  ;;  %p1367_p5 = por %p1529_p3, %p41_p8 }
  0x5c   : > { %s319_s28 = sand.u32 1, %s1149_s11   ;;  %s799_s29 = sshll.u32 %s1153_s12, 7 }
  0x5d   : > { %s798_s24 = sshll.u32 %s319_s28, 3  ;;  %s1376_s18 = scalar_lea.hbm %s1505_s0, %s799_s29 }
  0x5e   : > { %s323_s21 = scalar_lea.vmem [#allocation2], %s798_s24  ;;  %p1378_p10 = pnand %p907_p6, %p43_p0 }
  0x5f   : > { %s330_s23 = sshll.u32 %s323_s21, 4  ;;  %s320_s22 = scalar_lea.sflag [#allocation3], %s319_s28  ;;  %s1382_s23 = int_to_ptr.vmem [resolvable:$true] %s330_s23 }
  0x60   : > { %s1049_s9 = scalar_lea.hbm %s1376_s18, 128  ;;  %p1051_p9 = pneg %p1378_p10 }
  0x61   : > { %p1050_p7 = scmp.ne.s32.totalorder %s1376_s18, %s1049_s9  ;;  %s1054_s29 = scalar_lea.hbm %s1505_s0, 512 }
  0x62   : > { %p1055_p1 = scmp.lt.u32.totalorder %s1376_s18, %s1505_s0  ;;  %p1056_p2 = scmp.lt.u32.totalorder %s1054_s29, %s1049_s9 }
  0x63   : > { %p1052_p11 = pnand %p1051_p9, %p1050_p7  ;;  %p1058_p8 = scmp.lt.u32.totalorder %s1049_s9, %s1376_s18 }
  0x64   : > { %p1057_p4 = por %p1056_p2, %p1055_p1 }
  0x65   : > { %p1053_p13 = pneg %p1052_p11 }
  0x66   : > { %p1059_p12 = por %p1058_p8, %p1057_p4 }
  0x68   : > { %p1060_p6 = pnand %p1059_p12, %p1053_p13 }
  0x6a   : > { %1063 = shalt.err (!%p1060_p6)
}
  0x6b   : > { %s1064_s28 = scalar_lea.vmem %s1382_s23, 128  ;;  %s1160_s26 = smov [#allocation2]  }
  0x6c   : > { %p1065_p0 = scmp.ne.s32.totalorder %s1382_s23, %s1064_s28  ;;  %s1069_s21 = sshll.u32 %s1160_s26, 4  ;;  %s1070_s21 = int_to_ptr.vmem [resolvable:$false] %s1069_s21 }
  0x6d   : > { %s1071_s20 = scalar_lea.vmem %s1070_s21, 256  ;;  %p1072_p11 = scmp.lt.s32.totalorder %s1382_s23, %s1070_s21 }
  0x6e   : > { %p1067_p3 = pnand %p1065_p0, %p1051_p9  ;;  %p1073_p1 = scmp.lt.s32.totalorder %s1071_s20, %s1064_s28 }
  0x70   : > { %p1068_p7 = pneg %p1067_p3  ;;  %p1074_p2 = por %p1073_p1, %p1072_p11 }
  0x72   : > { %p1075_p4 = pnand %p1074_p2, %p1068_p7 }
  0x74   : > { %1078 = shalt.err (!%p1075_p4)
}
  0x75   : > { %899 = dma.hbm_to_vmem [thread:$0]  (!%p1378_p10), %s1376_s18, 128, %s1382_s23, %s320_s22  }
  0x76   : > { %p1532_p13 = scmp.ne.s32.totalorder %s1526_s17, 0 }
  0x77   : > { %s1412_s9 = sand.u32 (!%p1532_p13), 1, %s1145_s10   ;;  %p1533_p9 = scmp.ne.s32.totalorder (!%p1532_p13), %s1523_s15, 0 }
  0x78   : > { %339 = sbr.rel (%p1532_p13) target bundleno = 1072 (0x430), region = 56  ;;  %s801_s30 = sshll.u32 (!%p1532_p13), %s1412_s9, 3 }
  0x79   : > { %s342_s29 = scalar_lea.sflag (!%p1532_p13), [#allocation3], %s1412_s9  ;;  %s345_s24 = scalar_lea.vmem (!%p1532_p13), [#allocation2], %s801_s30 }
  0x7f   : > { %1124 = dma.done.wait (%p1533_p9), %s342_s29, 128  }
  0x80   : > { %1126 = vsyncadd (%p1533_p9), %s342_s29, 4294967168  ;;  %p1534_p10 = scmp.eq.s32.totalorder %s1235_s13, 0 }
  0x82   : > { %1128 = dma.done.wait (%p1534_p10), [#allocation6], 512   ;;  %p1535_p8 = pmov %p1534_p10 }
  0x84   : > { %1130 = vsyncadd (%p1535_p8), [#allocation6], 4294966784  ;;  %p1536_p12 = pmov %p1535_p8 }
  0x85   : > { %p1537_p6 = pmov %p1535_p8 }
  0x86   : > { %1132 = dma.done.wait (%p1536_p12), [#allocation9], 256  }
  0x87   : > { %1134 = vsyncadd (%p1537_p6), [#allocation9], 4294967040  ;;  %v1161_v0 = vmov 0.0   ;;  %vm1162_vm0 = vmmov 0   ;;  %v951_v1 = vld [vmem:[#allocation5] sm:$0xff]   ;;  %v952_v2 = vld [vmem:[#allocation5 + $0x8] sm:$0xff]  }
  0x88   : > { %838 = vmatprep.subr.bf16.mxu0 %v1161_v0  ;;  %842 = vmatprep.mubr.msk.bf16.mxu0 %vm1162_vm0, %v1161_v0  ;;  %v421_v3 = vld [vmem:[%s345_s24] sm:$0xff]  ;;  %vm439_vm1 = vcmask 261120   ;;  %v957_v33 = vld [vmem:[#allocation8] sm:$0xff]   ;;  %v958_v34 = vld [vmem:[#allocation8 + $0x8] sm:$0xff]   ;;  %s823_s24 = sshll.u32 %s1235_s13, 7  ;;  %s391_s15 = scalar_lea.vmem [#allocation10], %s801_s30 }
  0x89   : > { %846 = vmatprep.subr.bf16.mxu1 %v1161_v0  ;;  %850 = vmatprep.mubr.msk.bf16.mxu1 %vm1162_vm0, %v1161_v0  ;;  %v422_v4 = vpack.c.bf16 %v421_v3, %v421_v3  ;;  %v953_v5 = vld [vmem:[#allocation7] sm:$0xff]   ;;  %v954_v6 = vld [vmem:[#allocation7 + $0x8] sm:$0xff]   ;;  %s693_s17 = sshll.u32 %s391_s15, 4  ;;  %s1538_s19 = sld [smem:[#allocation17_spill]]  ;;  %s1464_s17 = int_to_ptr.vmem [resolvable:$true] %s693_s17 }
  0x8a   : > { %839 = vmatpush3.bf16.msra.mxu0 %v951_v1  ;;  %847 = vmatpush3.bf16.msra.mxu1 %v953_v5  ;;  %v806_v7 = vld [vmem:[%s1507_s2] ss:$0 sm:$0xff]  ;;  %v956_v20 = vld [vmem:[%s1510_s5 + $0x8] sm:$0xff]   ;;  %s680_s13 = scalar_lea.sflag [#allocation4], %s1412_s9  ;;  %s1079_s25 = scalar_lea.vmem %s1464_s17, 128 }
  0x8b   : > { %840 = vmatprep.subr.bf16.mxu0 %v1161_v0  ;;  %848 = vmatprep.subr.bf16.mxu1 %v1161_v0  ;;  %v955_v19 = vld [vmem:[%s1510_s5] sm:$0xff]   ;;  %p1080_p0 = scmp.ne.s32.totalorder %s1464_s17, %s1079_s25  ;;  %s1163_s30 = smov [#allocation10]  }
  0x8c   : > { %v807_v21 = vld [vmem:[%s1509_s4] ss:$0 sm:$0xff]  ;;  %s1083_s28 = sshll.u32 %s1163_s30, 4  ;;  %s1084_s28 = int_to_ptr.vmem [resolvable:$false] %s1083_s28 }
  0x8d   : > { %v808_v35 = vld [vmem:[%s1511_s6] ss:$0 sm:$0xff]  ;;  %p1081_p3 = pnand %p1080_p0, %p1367_p5  ;;  %s1085_s26 = scalar_lea.vmem %s1084_s28, 256 }
  0x8e   : > { %841 = vmatpush3.bf16.msra.mxu0 %v952_v2  ;;  %849 = vmatpush3.bf16.msra.mxu1 %v954_v6  ;;  %v809_v47 = vld [vmem:[%s1513_s8] ss:$0 sm:$0xff]  ;;  %p1086_p11 = scmp.lt.s32.totalorder %s1464_s17, %s1084_s28  ;;  %p1087_p1 = scmp.lt.s32.totalorder %s1085_s26, %s1079_s25 }
  0x8f   : > { %854 = vmatprep.subr.bf16.mxu0 %v1161_v0  ;;  %862 = vmatprep.subr.bf16.mxu1 %v1161_v0  ;;  %s1462_s22 = scalar_lea.hbm %s1538_s19, %s823_s24  ;;  %p1082_p7 = pneg %p1081_p3 }
  0x90   : > { %p1088_p2 = por %p1087_p1, %p1086_p11 }
  0x91   : > { %843 = vmatmul.mubr.msk.bf16.vlgmr.msra.gmra.mrb[0].mxu0 %vm439_vm1, %v422_v4 }
  0x92   : > { %858 = vmatprep.mubr.msk.bf16.mxu0 %vm1162_vm0, %v1161_v0  ;;  %855 = vmatpush3.bf16.msra.mxu0 %v955_v19  ;;  %p1089_p4 = pnand %p1088_p2, %p1082_p7 }
  0x93   : > { %856 = vmatprep.subr.bf16.mxu0 %v1161_v0 }
  0x96   : > { %857 = vmatpush3.bf16.msra.mxu0 %v956_v20 }
 0x164   : > { %v477_v8 = vpop.f32.mrb[0].mxu0 }
 0x165   : > { %v478_v9 = vadd.f32 %v806_v7, %v477_v8  ;;  %v844_v10 = vpop.f32.mrb[1].mxu0 }
 0x166   : > { %v480_v11 = vpop.f32.mrb[2].mxu0 }
 0x167   : > { %v484_v12 = vmul.f32 0.70710677, %v478_v9  ;;  %v845_v13 = vpop.f32.mrb[3].mxu0  ;;  %v483_v15 = vmul.f32 0.5, %v478_v9 }
 0x169   : > { %959 = verf.f32 %v484_v12 }
 0x173   : > { %v960_v14 = vpop.eup %959 }
 0x174   : > { %v486_v16 = vadd.f32 1.0, %v960_v14 }
 0x176   : > { %v487_v17 = vmul.f32 %v486_v16, %v483_v15 }
 0x178   : > { %v488_v18 = vpack.c.bf16 %v487_v17, %v487_v17 }
 0x17a   : > { %851 = vmatmul.mubr.msk.bf16.vlgmr.msra.gmra.mrb[0].mxu1 %vm439_vm1, %v488_v18 }
 0x17b   : > { %866 = vmatprep.mubr.msk.bf16.mxu1 %vm1162_vm0, %v1161_v0  ;;  %863 = vmatpush3.bf16.msra.mxu1 %v957_v33 }
 0x17c   : > { %864 = vmatprep.subr.bf16.mxu1 %v1161_v0 }
 0x17f   : > { %865 = vmatpush3.bf16.msra.mxu1 %v958_v34 }
 0x24d   : > { %v542_v22 = vpop.f32.mrb[0].mxu1 }
 0x24e   : > { %v543_v23 = vadd.f32 %v807_v21, %v542_v22  ;;  %v852_v24 = vpop.f32.mrb[1].mxu1 }
 0x24f   : > { %v545_v25 = vpop.f32.mrb[2].mxu1 }
 0x250   : > { %v549_v26 = vmul.f32 0.70710677, %v543_v23  ;;  %v853_v27 = vpop.f32.mrb[3].mxu1  ;;  %v548_v29 = vmul.f32 0.5, %v543_v23 }
 0x252   : > { %961 = verf.f32 %v549_v26 }
 0x25c   : > { %v962_v28 = vpop.eup %961 }
 0x25d   : > { %v551_v30 = vadd.f32 1.0, %v962_v28 }
 0x25f   : > { %v552_v31 = vmul.f32 %v551_v30, %v548_v29 }
 0x261   : > { %v553_v32 = vpack.c.bf16 %v552_v31, %v552_v31 }
 0x263   : > { %859 = vmatmul.mubr.msk.bf16.vlgmr.msra.gmra.mrb[4].mxu0 %vm439_vm1, %v553_v32 }
 0x336   : > { %v607_v36 = vpop.f32.mrb[4].mxu0 }
 0x337   : > { %v608_v37 = vadd.f32 %v808_v35, %v607_v36  ;;  %v860_v38 = vpop.f32.mrb[5].mxu0 }
 0x338   : > { %v610_v39 = vpop.f32.mrb[6].mxu0 }
 0x339   : > { %v614_v40 = vmul.f32 0.70710677, %v608_v37  ;;  %v861_v41 = vpop.f32.mrb[7].mxu0  ;;  %v613_v43 = vmul.f32 0.5, %v608_v37 }
 0x33b   : > { %963 = verf.f32 %v614_v40 }
 0x345   : > { %v964_v42 = vpop.eup %963 }
 0x346   : > { %v616_v44 = vadd.f32 1.0, %v964_v42 }
 0x348   : > { %v617_v45 = vmul.f32 %v616_v44, %v613_v43 }
 0x34a   : > { %v618_v46 = vpack.c.bf16 %v617_v45, %v617_v45 }
 0x34c   : > { %867 = vmatmul.mubr.msk.bf16.vlgmr.msra.gmra.mrb[4].mxu1 %vm439_vm1, %v618_v46 }
 0x41f   : > { %v672_v48 = vpop.f32.mrb[4].mxu1 }
 0x420   : > { %v673_v49 = vadd.f32 %v809_v47, %v672_v48  ;;  %v868_v50 = vpop.f32.mrb[5].mxu1 }
 0x421   : > { %v675_v51 = vpop.f32.mrb[6].mxu1 }
 0x422   : > { %678 = vst [vmem:[%s391_s15] sm:$0xff] %v673_v49  ;;  %v869_v52 = vpop.f32.mrb[7].mxu1 }
 0x423   : > { %1092 = shalt.err (!%p1089_p4)
}
 0x424   : > { %s1093_s9 = scalar_lea.hbm %s1462_s22, 128  ;;  %s1097_s29 = scalar_lea.hbm %s1538_s19, 512 }
 0x425   : > { %p1094_p13 = scmp.ne.s32.totalorder %s1462_s22, %s1093_s9  ;;  %p1098_p8 = scmp.lt.u32.totalorder %s1462_s22, %s1538_s19 }
 0x426   : > { %p1099_p12 = scmp.lt.u32.totalorder %s1097_s29, %s1093_s9  ;;  %p1101_p0 = scmp.lt.u32.totalorder %s1093_s9, %s1462_s22 }
 0x427   : > { %p1095_p9 = pnand %p1094_p13, %p1367_p5 }
 0x428   : > { %p1100_p6 = por %p1099_p12, %p1098_p8 }
 0x429   : > { %p1096_p10 = pneg %p1095_p9 }
 0x42a   : > { %p1102_p3 = por %p1101_p0, %p1100_p6 }
 0x42c   : > { %p1103_p7 = pnand %p1102_p3, %p1096_p10 }
 0x42e   : > { %1106 = shalt.err (!%p1103_p7)
}
 0x42f   : > { %884 = dma.vmem_to_hbm [thread:$0]  (%p1367_p5), %s1464_s17, 128, %s1462_s22, %s680_s13  }
 0x430 PF: > { %s1539_s18 = sld [smem:[#allocation15_spill]]  ;;  %s1540_s23 = sld [smem:[#allocation16_spill]] }
 0x431   : > { %p911_p11 = scmp.ge.s32.totalorder %s1153_s12, 2 }
 0x436   : > { %s705_s25 = sand.u32 1, %s1539_s18   ;;  %p1541_p1 = scmp.ne.s32.totalorder %s1540_s23, 0 }
 0x437   : > { %s706_s30 = scalar_lea.sflag [#allocation4], %s705_s25 }
 0x438   : > { %p901_p2 = pnand %p911_p11, %p1541_p1 }
 0x43a   : > { %1136 = dma.done.wait (!%p901_p2), %s706_s30, 128  }
 0x43b   : > { %1138 = vsyncadd (!%p901_p2), %s706_s30, 4294967168  ;;  %p24_p4 = scmp.ge.s32.totalorder %s1353_s14, 6   ;;  %s1542_s30 = smov %s1145_s10 }
 0x43c   : > { %s1543_s10 = smov %s1149_s11  ;;  %s1544_s11 = smov %s1363_s16 }
 0x43d   : > { %s1545_s12 = smov %s1353_s14  ;;  %26 = sbr.rel (!%p24_p4) target bundleno = 9 (0x9), region = 113 }
 0x444   :  { %711 = vsyncpa [#allocation3], 1 }
 0x445   :  { %713 = vsyncpa [#allocation3 + $0x1], 1 }
 0x446   :  { %714 = vsyncpa [#allocation6], 1 }
 0x447   :  { %715 = vsyncpa [#allocation9], 1 }
 0x448   :  { %716 = vsyncpa [#allocation4], 1 }
 0x449   :  { %718 = vsyncpa [#allocation4 + $0x1], 1 }

</bundles_post_ra>
